<compile_context>
chip_gen: v7x
topology: tpu7x:2x2x1
jax: 0.10.0
libtpu: 0.0.40
codegen_flags: <defaults>
</compile_context>

<pallas_src>
import functools
import numpy as np

import jax
import jax.numpy as jnp
from jax.experimental import pallas as pl
from jax.experimental.pallas import tpu as pltpu

F32 = jnp.float32
BF16 = jnp.bfloat16


def _round_up(x, m):
    return ((x + m - 1) // m) * m


# ----------------------------------------------------------------------------
# Kernel 1: VanillaConv forward, one grid step per example
#   conv (sum of shifted MXU dots, no im2col concat) + ReLU + max-pool-over-time
#   for the three filter sizes, written into one lane-dense 128-wide row.
# ----------------------------------------------------------------------------
def _cnn_kernel(x_ref, w3_ref, w5_ref, w7_ref, b3_ref, b5_ref, b7_ref, o_ref,
                *, seq_len, filter_sizes, out_pad):
    x = x_ref[0].astype(BF16)                                # (L, E)
    w_refs = (w3_ref, w5_ref, w7_ref)
    b_refs = (b3_ref, b5_ref, b7_ref)
    pooled = []
    for fs, w_r, b_r in zip(filter_sizes, w_refs, b_refs):
        t_out = seq_len - fs + 1
        acc = jnp.dot(x[0:t_out, :], w_r[0], preferred_element_type=F32)
        for r in range(1, fs):
            acc = acc + jnp.dot(x[r:r + t_out, :], w_r[r],
                                preferred_element_type=F32)
        acc = jnp.maximum(acc + b_r[...], 0.0)               # F.relu, (t_out, F)
        pooled.append(jnp.max(acc, axis=0, keepdims=True))   # max_pool1d over time
    if out_pad > 0:
        pooled.append(jnp.zeros((1, out_pad), F32))
    o_ref[0] = jnp.concatenate(pooled, axis=1)               # (1, EHRPAD) lane-dense


# ----------------------------------------------------------------------------
# Kernel 2: fused per-hop step, one grid step per example (all k beams at once)
#   [GRU step of previous hop's selection (path-encoder folded into ih gates)]
#   + hidden.sum + relu(attn) state + DQN stand-in q-scores over ALL nodes.
# ----------------------------------------------------------------------------
def _step_kernel(flag_ref, ids_ref, ehr_ref, h_ref,
                 nodes_ref, nodes_t_ref,
                 wc_ref, wl_ref, bih_ref, whh_ref, bhh_ref,
                 wah_ref, wae_ref, battn_ref, wdqn_ref, bdqn_ref,
                 h_out_ref, slab_ref,
                 *, k, hsize, npad):
    dot = functools.partial(jnp.dot, preferred_element_type=F32)
    H = hsize

    flag = flag_ref[0, 0]                 # 0.0 at hop 0 (no GRU yet, hidden sum = 0)
    h_old = h_ref[0]                      # (k, H) persistent decoder hidden (f32)

    # --- node-embedding lookups via one-hot MXU matmul (ids[:k]=cur, ids[k:]=last)
    ids = ids_ref[0]                                              # (2k, 1) int32
    iota = jax.lax.broadcasted_iota(jnp.int32, (2 * k, npad), 1)
    onehot = jnp.where(iota == ids, 1.0, 0.0).astype(BF16)        # (2k, NPAD)
    embs = dot(onehot, nodes_ref[...])                            # (2k, ne) f32
    cur = embs[:k].astype(BF16)
    last = embs[k:].astype(BF16)

    # --- PathEncoder folded into GRU input gates + single-step GRU (gates r|z|n)
    gi = dot(cur, wc_ref[...]) + dot(last, wl_ref[...]) + bih_ref[...]   # (k, 3H)
    gh = dot(h_old.astype(BF16), whh_ref[...]) + bhh_ref[...]            # (k, 3H)
    r = jax.nn.sigmoid(gi[:, 0:H] + gh[:, 0:H])
    z = jax.nn.sigmoid(gi[:, H:2 * H] + gh[:, H:2 * H])
    n = jnp.tanh(gi[:, 2 * H:] + r * gh[:, 2 * H:])
    h_gru = (1.0 - z) * n + z * h_old
    h_new = flag * h_gru + (1.0 - flag) * h_old          # hop 0: GRU is a no-op
    h_out_ref[0] = h_new                                 # aliased, stays on device

    # --- state = relu(attn([hidden.sum(dim=1) || ehrRrep]))  (padded to 128 lanes)
    hsum = flag * jnp.sum(h_new, axis=0, keepdims=True)          # (1, H)
    state = jnp.maximum(
        dot(hsum.astype(BF16), wah_ref[...]) +
        dot(ehr_ref[0].astype(BF16), wae_ref[...]) + battn_ref[...], 0.0)  # (1, SP)

    # --- DQN stand-in scorer: q[node] = proj(state) . node_embedding[node]
    proj = dot(state.astype(BF16), wdqn_ref[...]) + bdqn_ref[...]          # (1, ne)
    q = dot(proj.astype(BF16), nodes_t_ref[...])                           # (1, NPAD)

    slab_ref[0] = jnp.concatenate([state, q], axis=1)    # one lane-dense 256w store


# ----------------------------------------------------------------------------
# Python glue replicating the reference module's control flow
# ----------------------------------------------------------------------------
class Args:
    pass


def action_space(parients, args):
    children = [np.nonzero(args.adj[p])[0] for p in parients]
    children_len = [len(row) for row in children]
    padded = []
    for row in children:
        row = [int(c) for c in row]
        row = row + [0] * (args.max_children_num - len(row))
        padded.append(row)
    return np.array(padded, dtype=np.int32), np.array(children_len, dtype=np.int32)


class Generator:
    def __init__(self, args, vocab_size, level2_parients, key):
        self.args = args
        self.level2_parients = list(level2_parients)
        ne = args.node_embedding_size
        E = args.cnn_embedding_size
        Fn = args.num_filter_maps
        H = args.path_hidden_size
        k = args.k
        n_nodes = len(args.node2id)
        assert H == ne, "GRU input (path encoder output) must equal hidden size"
        assert Fn == ne, "attn expects cat(hidden, ehrRrep) of width 4*ne"

        self.filter_sizes = [3, 5, 7]
        self.n_nodes = n_nodes
        self.n_state = 3 * ne
        self.EHRPAD = _round_up(3 * Fn, 128)        # lane-padded CNN output width
        self.STATEPAD = _round_up(3 * ne, 128)      # lane-padded state width
        self.NPAD = _round_up(max(n_nodes, 8), 128)  # lane-padded #nodes (q width)
        self.SLAB = self.STATEPAD + self.NPAD
        self.q_off = self.STATEPAD

        keys = jax.random.split(key, 24)
        u = lambda kk, shape, s=0.1: jax.random.uniform(kk, shape, F32, -s, s)

        # ---- VanillaConv (conv weights (fs, E, F), pre-cast to bf16) ----------
        self.cnn_embedding = u(keys[0], (vocab_size, E), 0.5)
        self.cnn_embedding_np = np.asarray(self.cnn_embedding)
        self.conv_w, self.conv_b = [], []
        for idx, fs in enumerate(self.filter_sizes):
            w = u(keys[1 + idx], (Fn, fs, E))       # torch Conv2d weight (F,1,fs,E) squeezed
            self.conv_w.append(jnp.transpose(w, (1, 2, 0)).astype(BF16))  # (fs, E, F)
            self.conv_b.append(u(keys[4 + idx], (1, Fn)))
        # TODO(synk): nn.Dropout is a no-op here (deterministic eval-mode forward).

        # ---- PathEncoder ------------------------------------------------------
        # TODO(synk): GCN preprocessing of the embedding table is skipped
        # (GCNNet is not defined in the reference source).
        node_emb = u(keys[7], (n_nodes, ne), 0.5)
        w_path_cur = u(keys[8], (ne, ne))           # w_path split (cur half || last half)
        w_path_last = u(keys[9], (ne, ne))
        b_path = u(keys[10], (1, ne))

        # ---- PathDecoder (GRU cell; gates r|z|n concatenated on the lane axis) -
        gru_wih = u(keys[11], (H, 3 * H))
        gru_whh = u(keys[12], (H, 3 * H))
        gru_bih = u(keys[13], (1, 3 * H))
        gru_bhh = u(keys[14], (1, 3 * H))
        self.dec_hidden = jnp.zeros((k, H), F32)    # == torch (1, k, H), persists

        # fold PathEncoder into GRU input gates:
        #   gi = path @ Wih + bih,  path = cur@Wpc + last@Wpl + bp
        #     => gi = cur@(Wpc@Wih) + last@(Wpl@Wih) + (bp@Wih + bih)
        self.w_cur_gates = (w_path_cur @ gru_wih).astype(BF16)
        self.w_last_gates = (w_path_last @ gru_wih).astype(BF16)
        self.b_ih_fold = (b_path @ gru_wih + gru_bih).astype(F32)
        self.w_hh_gates = gru_whh.astype(BF16)
        self.b_hh = gru_bhh.astype(F32)

        # node-embedding table, padded + transposed, kept resident as kernel inputs
        node_pad = jnp.zeros((self.NPAD, ne), F32).at[:n_nodes].set(node_emb)
        self.node_emb_pad_bf = node_pad.astype(BF16)              # (NPAD, ne)
        self.node_emb_T_bf = jnp.transpose(node_pad).astype(BF16)  # (ne, NPAD)
        self.node_embedding_np = np.asarray(node_emb)

        # ---- Generator-level params (attn split into hidden-cols / ehr-cols) ---
        w_attn_h = u(keys[15], (H, 3 * ne))
        w_attn_e = u(keys[16], (3 * Fn, 3 * ne))
        b_attn = u(keys[17], (1, 3 * ne))
        self.w_attn_h_pad = (jnp.zeros((H, self.STATEPAD), F32)
                             .at[:, :3 * ne].set(w_attn_h)).astype(BF16)
        self.w_attn_e_pad = (jnp.zeros((self.EHRPAD, self.STATEPAD), F32)
                             .at[:3 * Fn, :3 * ne].set(w_attn_e)).astype(BF16)
        self.b_attn_pad = jnp.zeros((1, self.STATEPAD), F32).at[:, :3 * ne].set(b_attn)
        self.w_attn_combine = u(keys[18], (2 * ne, ne))  # unused in forward (parity)
        self.r_x = u(keys[19], (ne, 3 * ne))             # unused in forward (parity)
        self.b_x = u(keys[20], (ne, 3 * ne))             # unused in forward (parity)

        # TODO(synk): DQN class is not provided in the reference; stand-in scorer
        # (linear projection of state dotted with node embeddings).
        w_dqn = u(keys[21], (3 * ne, ne))
        self.w_dqn_pad = (jnp.zeros((self.STATEPAD, ne), F32)
                          .at[:3 * ne].set(w_dqn)).astype(BF16)
        self.b_dqn = jnp.zeros((1, ne), F32)

        # cached device scalars / zero-id tables: no per-hop H2D for these
        self._flag0 = jnp.zeros((1, 1), F32)
        self._flag1 = jnp.ones((1, 1), F32)
        self._ids0 = {}

        self.sequences = []
        self._cnn_cache = {}
        self._step_cache = {}

    # ---- build the batched per-hop kernel once per batch size -----------------
    def _get_step_fn(self, B):
        if B in self._step_cache:
            return self._step_cache[B]
        args = self.args
        ne = args.node_embedding_size
        H = args.path_hidden_size
        k = args.k

        kern = functools.partial(_step_kernel, k=k, hsize=H, npad=self.NPAD)
        call = pl.pallas_call(
            kern,
            out_shape=(jax.ShapeDtypeStruct((B, k, H), F32),
                       jax.ShapeDtypeStruct((B, 1, self.SLAB), F32)),
            grid=(B,),
            in_specs=[
                pl.BlockSpec((1, 1), lambda b: (0, 0)),                        # flag
                pl.BlockSpec((1, 2 * k, 1), lambda b: (b, 0, 0)),              # cur|last ids
                pl.BlockSpec((1, 1, self.EHRPAD), lambda b: (b, 0, 0)),        # ehrRrep
                pl.BlockSpec((1, k, H), lambda b: (b, 0, 0)),                  # decoder hidden
                pl.BlockSpec((self.NPAD, ne), lambda b: (0, 0)),               # node emb
                pl.BlockSpec((ne, self.NPAD), lambda b: (0, 0)),               # node emb^T
                pl.BlockSpec((ne, 3 * H), lambda b: (0, 0)),                   # W cur->gates
                pl.BlockSpec((ne, 3 * H), lambda b: (0, 0)),                   # W last->gates
                pl.BlockSpec((1, 3 * H), lambda b: (0, 0)),                    # b ih (folded)
                pl.BlockSpec((H, 3 * H), lambda b: (0, 0)),                    # W hh
                pl.BlockSpec((1, 3 * H), lambda b: (0, 0)),                    # b hh
                pl.BlockSpec((H, self.STATEPAD), lambda b: (0, 0)),            # attn (hidden cols)
                pl.BlockSpec((self.EHRPAD, self.STATEPAD), lambda b: (0, 0)),  # attn (ehr cols)
                pl.BlockSpec((1, self.STATEPAD), lambda b: (0, 0)),            # attn bias
                pl.BlockSpec((self.STATEPAD, ne), lambda b: (0, 0)),           # dqn W
                pl.BlockSpec((1, ne), lambda b: (0, 0)),                       # dqn b
            ],
            out_specs=(pl.BlockSpec((1, k, H), lambda b: (b, 0, 0)),
                       pl.BlockSpec((1, 1, self.SLAB), lambda b: (b, 0, 0))),
            input_output_aliases={3: 0},     # decoder hidden updated in place
            compiler_params=pltpu.CompilerParams(dimension_semantics=("parallel",)),
        )

        weights = (self.node_emb_pad_bf, self.node_emb_T_bf,
                   self.w_cur_gates, self.w_last_gates, self.b_ih_fold,
                   self.w_hh_gates, self.b_hh,
                   self.w_attn_h_pad, self.w_attn_e_pad, self.b_attn_pad,
                   self.w_dqn_pad, self.b_dqn)

        def run(flag, ids, ehr, h):
            return call(flag, ids, ehr, h, *weights)

        fn = jax.jit(run)
        self._step_cache[B] = fn
        return fn

    def _get_cnn_fn(self, B, L):
        key = (B, L)
        if key in self._cnn_cache:
            return self._cnn_cache[key]
        args = self.args
        E = args.cnn_embedding_size
        Fn = args.num_filter_maps
        out_pad = self.EHRPAD - 3 * Fn

        in_specs = [pl.BlockSpec((1, L, E), lambda b: (b, 0, 0))]
        for fs in self.filter_sizes:
            in_specs.append(pl.BlockSpec((fs, E, Fn), lambda b: (0, 0, 0)))
        for _ in self.filter_sizes:
            in_specs.append(pl.BlockSpec((1, Fn), lambda b: (0, 0)))

        call = pl.pallas_call(
            functools.partial(_cnn_kernel, seq_len=L,
                              filter_sizes=tuple(self.filter_sizes),
                              out_pad=out_pad),
            out_shape=jax.ShapeDtypeStruct((B, 1, self.EHRPAD), F32),
            grid=(B,),
            in_specs=in_specs,
            out_specs=pl.BlockSpec((1, 1, self.EHRPAD), lambda b: (b, 0, 0)),
            compiler_params=pltpu.CompilerParams(dimension_semantics=("parallel",)),
        )
        w = tuple(self.conv_w)
        bb = tuple(self.conv_b)
        fn = jax.jit(lambda x: call(x, *w, *bb))
        self._cnn_cache[key] = fn
        return fn

    def _get_ids0(self, B):
        if B not in self._ids0:
            self._ids0[B] = jnp.zeros((B, 2 * self.args.k, 1), jnp.int32)
        return self._ids0[B]

    # ---- Generator.beam_search (verbatim logic, prints removed) ---------------
    def beam_search(self, data, actions_store):
        all_candidates = list()
        for sequence, row, actions in zip(self.sequences, data, actions_store):
            seq, score = sequence
            for j in range(len(row)):
                candidate = [seq + [int(actions[j])], score + float(row[j])]
                all_candidates.append(candidate)
            ordered = sorted(all_candidates, key=lambda tup: tup[1], reverse=True)
            self.sequences = ordered[:self.args.k]
        selected_action = [row[0][-1] for row in self.sequences]
        selected_path = [row[0] for row in self.sequences]
        return selected_action, selected_path

    # ---- Generator.step --------------------------------------------------------
    def step(self, actionList, hier_label, hop):
        hop_tures = []
        for row in hier_label:
            hop_tures.extend(row)
        reward = -1
        for row in actionList:
            reward = 1 if row[hop + 1] in hop_tures else -1
        done = (hop == 3)
        return reward, done

    # ---- Generator.forward -----------------------------------------------------
    def forward(self, ehrs, hier_labels):
        args = self.args
        k = args.k
        B = len(ehrs)

        # ---- batched CNN: one fused launch for the whole batch -----------------
        lens = {len(row) for row in ehrs}
        assert len(lens) == 1, \
            "TODO(synk): ragged EHR lengths would need per-length CNN compiles"
        tok_ids = np.asarray(ehrs, dtype=np.int32)               # (B, L)
        x_emb = self.cnn_embedding_np[tok_ids]                   # host gather (B, L, E)
        cnn_fn = self._get_cnn_fn(B, tok_ids.shape[1])
        ehr_reps = cnn_fn(x_emb)                                 # (B, 1, EHRPAD), device

        step_fn = self._get_step_fn(B)

        # ---- per-example host bookkeeping ---------------------------------------
        root = args.node2id.get('ROOT')
        seqs = [[[[root], 1.0]] for _ in range(B)]
        selected_action = [None] * B
        actionList = [None] * B
        example_states = [[] for _ in range(B)]
        example_rewards = [[] for _ in range(B)]
        example_done = [[] for _ in range(B)]
        example_actionIndexs = [[] for _ in range(B)]
        children_all = [None] * B
        children_len_all = [None] * B

        # TODO(synk): the reference chains pathDecoder.hidden sequentially from
        # example i to i+1; the batched step starts every example from the hidden
        # snapshot taken at forward() entry (the last example's hidden persists).
        dec_h = jnp.tile(self.dec_hidden[None, :, :], (B, 1, 1))  # (B, k, H), device

        l2 = np.asarray(self.level2_parients, dtype=np.int32)

        for hop in range(args.hops):
            if hop == 0:
                flag = self._flag0
                ids_dev = self._get_ids0(B)                       # cached, no H2D
            else:
                flag = self._flag1
                ids_host = np.zeros((B, 2 * k, 1), np.int32)      # only per-hop H2D
                for i in range(B):
                    cur = np.asarray(selected_action[i], dtype=np.int32)[:k]
                    last = np.asarray([row[-2] for row in actionList[i]],
                                      dtype=np.int32)[:k]
                    ids_host[i, :len(cur), 0] = cur
                    ids_host[i, k:k + len(last), 0] = last
                    ch, chl = action_space(selected_action[i], args)
                    children_all[i], children_len_all[i] = ch, chl
                ids_dev = ids_host

            # one fused device step for the whole batch
            dec_h, slab = step_fn(flag, ids_dev, ehr_reps, dec_h)
            slab_np = np.asarray(slab)                   # single host sync per hop

            for i in range(B):
                state_np = slab_np[i, :, :self.n_state]               # (1, 3*ne)
                q_all = slab_np[i, 0, self.q_off:self.q_off + self.n_nodes]

                if hop == 0:
                    beams_children = [l2]
                else:
                    ch, chl = children_all[i], children_len_all[i]
                    beams_children = [ch[b, :int(chl[b])] for b in range(ch.shape[0])]
                action_values = [q_all[np.asarray(c, dtype=np.int64)]
                                 for c in beams_children]
                actionIndexs = [np.arange(len(c)).reshape(-1, 1)
                                for c in beams_children]

                self.sequences = seqs[i]
                sel, al = self.beam_search(action_values, beams_children)
                seqs[i] = self.sequences
                selected_action[i], actionList[i] = sel, al

                reward, done = self.step(al, hier_labels[i], hop)
                example_rewards[i].append(reward)
                example_states[i].append(state_np)
                example_done[i].append(done)
                example_actionIndexs[i].append(actionIndexs)

        # ---- trailing GRU step of the last hop + final attn state ----------------
        ids_host = np.zeros((B, 2 * k, 1), np.int32)
        for i in range(B):
            cur = np.asarray(selected_action[i], dtype=np.int32)[:k]
            last = np.asarray([row[-2] for row in actionList[i]], dtype=np.int32)[:k]
            ids_host[i, :len(cur), 0] = cur
            ids_host[i, k:k + len(last), 0] = last
        dec_h, slab = step_fn(self._flag1, ids_host, ehr_reps, dec_h)
        slab_np = np.asarray(slab)

        state = None
        for i in range(B):
            state_np = slab_np[i, :, :self.n_state]
            example_states[i].append(state_np)
            state = state_np
        # TODO(synk): DQN replay-buffer pushes omitted (DQN class not provided).

        self.dec_hidden = dec_h[B - 1]                 # persists across forward calls
        batchPaths = [actionList[i] for i in range(B)]
        return batchPaths, state


# ----------------------------------------------------------------------------
# main
# ----------------------------------------------------------------------------
if __name__ == "__main__":
    key = jax.random.PRNGKey(0)

    args = Args()
    args.node_embedding_size = 16
    args.cnn_embedding_size = 32
    args.num_filter_maps = 16          # so 3*F == 3*ne  (attn input = hidden + ehrRrep)
    args.path_hidden_size = 16         # must equal node_embedding_size (GRU input)
    args.hops = 4
    args.k = 4
    args.max_children_num = 8
    args.dropout_rate = 0.25
    n_nodes = 30
    args.node2id = {'ROOT': 0}
    for n in range(1, n_nodes):
        args.node2id[f'n{n}'] = n

    # deterministic adjacency (every node has 1-3 children in [1, 29])
    adj = np.zeros((n_nodes, n_nodes), dtype=np.int32)
    for p in range(n_nodes):
        for c in {(p * 7 + 1) % 29 + 1, (p * 5 + 2) % 29 + 1, (p * 3 + 4) % 29 + 1}:
            adj[p, c] = 1
    args.adj = adj

    level2_parients = list(range(1, 14))   # 13 level-2 parents, as in the reference

    vocab_size = 50
    seq_len = 20
    batch = 2

    k_ehr, k_params = jax.random.split(key)
    ehrs = np.asarray(
        jax.random.randint(k_ehr, (batch, seq_len), 0, vocab_size), dtype=np.int32)
    ehrs = [list(map(int, row)) for row in ehrs]
    hier_labels = [
        [[1, 5], [10, 12], [20, 22], [25]],
        [[2, 6], [11, 13], [21], [26, 28]],
    ]

    gen = Generator(args, vocab_size=vocab_size,
                    level2_parients=level2_parients, key=k_params)

    batch_paths, last_state = gen.forward(ehrs, hier_labels)
    jax.block_until_ready(gen.dec_hidden)
    jax.block_until_ready(last_state)
    assert len(batch_paths) == batch
    assert all(len(p) == args.k and len(p[0]) == args.hops + 1 for p in batch_paths)
    assert last_state.shape == (1, 3 * args.node_embedding_size)
    print("KERNEL_OK")
</pallas_src>

<mosaic_0001>
module attributes {stable_mosaic.version = 11 : i64} {
  func.func @_cnn_kernel(%arg0: i32, %arg1: memref<1x20x32xf32, #tpu.memory_space<vmem>>, %arg2: memref<3x32x16xbf16, #tpu.memory_space<vmem>>, %arg3: memref<5x32x16xbf16, #tpu.memory_space<vmem>>, %arg4: memref<7x32x16xbf16, #tpu.memory_space<vmem>>, %arg5: memref<1x16xf32, #tpu.memory_space<vmem>>, %arg6: memref<1x16xf32, #tpu.memory_space<vmem>>, %arg7: memref<1x16xf32, #tpu.memory_space<vmem>>, %arg8: memref<1x1x128xf32, #tpu.memory_space<vmem>>) attributes {dimension_semantics = [#tpu.dimension_semantics<parallel>], iteration_bounds = array<i64: 2>, scalar_prefetch = 0 : i64, scratch_operands = 0 : i64, tpu.core_type = #tpu.core_type<tc>, window_params = [{transform_indices = @transform_0, window_bounds = array<i64: 1, 20, 32>}, {pipeline_mode = #tpu.pipeline_mode<synchronous>, transform_indices = @transform_1, window_bounds = array<i64: 3, 32, 16>}, {pipeline_mode = #tpu.pipeline_mode<synchronous>, transform_indices = @transform_2, window_bounds = array<i64: 5, 32, 16>}, {pipeline_mode = #tpu.pipeline_mode<synchronous>, transform_indices = @transform_3, window_bounds = array<i64: 7, 32, 16>}, {pipeline_mode = #tpu.pipeline_mode<synchronous>, transform_indices = @transform_4, window_bounds = array<i64: 1, 16>}, {pipeline_mode = #tpu.pipeline_mode<synchronous>, transform_indices = @transform_5, window_bounds = array<i64: 1, 16>}, {pipeline_mode = #tpu.pipeline_mode<synchronous>, transform_indices = @transform_6, window_bounds = array<i64: 1, 16>}, {transform_indices = @transform_7, window_bounds = array<i64: 1, 1, 128>}]} {
    %c0 = arith.constant 0 : index
    %c0_0 = arith.constant 0 : index
    %c0_1 = arith.constant 0 : index
    %0 = vector.load %arg1[%c0, %c0_0, %c0_1] : memref<1x20x32xf32, #tpu.memory_space<vmem>>, vector<1x20x32xf32>
    %1 = vector.shape_cast %0 : vector<1x20x32xf32> to vector<20x32xf32>
    %2 = arith.truncf %1 : vector<20x32xf32> to vector<20x32xbf16>
    %3 = vector.extract_strided_slice %2 {offsets = [0, 0], sizes = [18, 32], strides = [1, 1]} : vector<20x32xbf16> to vector<18x32xbf16>
    %c0_2 = arith.constant 0 : index
    %c0_3 = arith.constant 0 : index
    %c0_4 = arith.constant 0 : index
    %4 = vector.load %arg2[%c0_2, %c0_3, %c0_4] : memref<3x32x16xbf16, #tpu.memory_space<vmem>>, vector<1x32x16xbf16>
    %5 = vector.shape_cast %4 : vector<1x32x16xbf16> to vector<32x16xbf16>
    %cst = arith.constant dense<0.000000e+00> : vector<18x16xf32>
    %6 = tpu.matmul %3, %5, %cst {dimension_numbers = #tpu.dot_dimension_numbers<[1], [0], [0], [1], [0, 0, 1, 1], [], []>} : vector<18x32xbf16>, vector<32x16xbf16>, vector<18x16xf32> -> vector<18x16xf32>
    %7 = vector.extract_strided_slice %2 {offsets = [1, 0], sizes = [18, 32], strides = [1, 1]} : vector<20x32xbf16> to vector<18x32xbf16>
    %c1 = arith.constant 1 : index
    %c0_5 = arith.constant 0 : index
    %c0_6 = arith.constant 0 : index
    %8 = vector.load %arg2[%c1, %c0_5, %c0_6] : memref<3x32x16xbf16, #tpu.memory_space<vmem>>, vector<1x32x16xbf16>
    %9 = vector.shape_cast %8 : vector<1x32x16xbf16> to vector<32x16xbf16>
    %cst_7 = arith.constant dense<0.000000e+00> : vector<18x16xf32>
    %10 = tpu.matmul %7, %9, %cst_7 {dimension_numbers = #tpu.dot_dimension_numbers<[1], [0], [0], [1], [0, 0, 1, 1], [], []>} : vector<18x32xbf16>, vector<32x16xbf16>, vector<18x16xf32> -> vector<18x16xf32>
    %11 = arith.addf %6, %10 : vector<18x16xf32>
    %12 = vector.extract_strided_slice %2 {offsets = [2, 0], sizes = [18, 32], strides = [1, 1]} : vector<20x32xbf16> to vector<18x32xbf16>
    %c2 = arith.constant 2 : index
    %c0_8 = arith.constant 0 : index
    %c0_9 = arith.constant 0 : index
    %13 = vector.load %arg2[%c2, %c0_8, %c0_9] : memref<3x32x16xbf16, #tpu.memory_space<vmem>>, vector<1x32x16xbf16>
    %14 = vector.shape_cast %13 : vector<1x32x16xbf16> to vector<32x16xbf16>
    %cst_10 = arith.constant dense<0.000000e+00> : vector<18x16xf32>
    %15 = tpu.matmul %12, %14, %cst_10 {dimension_numbers = #tpu.dot_dimension_numbers<[1], [0], [0], [1], [0, 0, 1, 1], [], []>} : vector<18x32xbf16>, vector<32x16xbf16>, vector<18x16xf32> -> vector<18x16xf32>
    %16 = arith.addf %11, %15 : vector<18x16xf32>
    %c0_11 = arith.constant 0 : index
    %c0_12 = arith.constant 0 : index
    %17 = vector.load %arg5[%c0_11, %c0_12] : memref<1x16xf32, #tpu.memory_space<vmem>>, vector<1x16xf32>
    %18 = vector.broadcast %17 : vector<1x16xf32> to vector<18x16xf32>
    %19 = arith.addf %16, %18 : vector<18x16xf32>
    %cst_13 = arith.constant 0.000000e+00 : f32
    %20 = vector.broadcast %cst_13 : f32 to vector<18x16xf32>
    %21 = arith.maximumf %19, %20 : vector<18x16xf32>
    %cst_14 = arith.constant dense<0xFF800000> : vector<16xf32>
    %22 = vector.multi_reduction <maximumf>, %21, %cst_14 [0] : vector<18x16xf32> to vector<16xf32>
    %23 = vector.shape_cast %22 : vector<16xf32> to vector<1x16xf32>
    %24 = vector.extract_strided_slice %2 {offsets = [0, 0], sizes = [16, 32], strides = [1, 1]} : vector<20x32xbf16> to vector<16x32xbf16>
    %c0_15 = arith.constant 0 : index
    %c0_16 = arith.constant 0 : index
    %c0_17 = arith.constant 0 : index
    %25 = vector.load %arg3[%c0_15, %c0_16, %c0_17] : memref<5x32x16xbf16, #tpu.memory_space<vmem>>, vector<1x32x16xbf16>
    %26 = vector.shape_cast %25 : vector<1x32x16xbf16> to vector<32x16xbf16>
    %cst_18 = arith.constant dense<0.000000e+00> : vector<16x16xf32>
    %27 = tpu.matmul %24, %26, %cst_18 {dimension_numbers = #tpu.dot_dimension_numbers<[1], [0], [0], [1], [0, 0, 1, 1], [], []>} : vector<16x32xbf16>, vector<32x16xbf16>, vector<16x16xf32> -> vector<16x16xf32>
    %28 = vector.extract_strided_slice %2 {offsets = [1, 0], sizes = [16, 32], strides = [1, 1]} : vector<20x32xbf16> to vector<16x32xbf16>
    %c1_19 = arith.constant 1 : index
    %c0_20 = arith.constant 0 : index
    %c0_21 = arith.constant 0 : index
    %29 = vector.load %arg3[%c1_19, %c0_20, %c0_21] : memref<5x32x16xbf16, #tpu.memory_space<vmem>>, vector<1x32x16xbf16>
    %30 = vector.shape_cast %29 : vector<1x32x16xbf16> to vector<32x16xbf16>
    %cst_22 = arith.constant dense<0.000000e+00> : vector<16x16xf32>
    %31 = tpu.matmul %28, %30, %cst_22 {dimension_numbers = #tpu.dot_dimension_numbers<[1], [0], [0], [1], [0, 0, 1, 1], [], []>} : vector<16x32xbf16>, vector<32x16xbf16>, vector<16x16xf32> -> vector<16x16xf32>
    %32 = arith.addf %27, %31 : vector<16x16xf32>
    %33 = vector.extract_strided_slice %2 {offsets = [2, 0], sizes = [16, 32], strides = [1, 1]} : vector<20x32xbf16> to vector<16x32xbf16>
    %c2_23 = arith.constant 2 : index
    %c0_24 = arith.constant 0 : index
    %c0_25 = arith.constant 0 : index
    %34 = vector.load %arg3[%c2_23, %c0_24, %c0_25] : memref<5x32x16xbf16, #tpu.memory_space<vmem>>, vector<1x32x16xbf16>
    %35 = vector.shape_cast %34 : vector<1x32x16xbf16> to vector<32x16xbf16>
    %cst_26 = arith.constant dense<0.000000e+00> : vector<16x16xf32>
    %36 = tpu.matmul %33, %35, %cst_26 {dimension_numbers = #tpu.dot_dimension_numbers<[1], [0], [0], [1], [0, 0, 1, 1], [], []>} : vector<16x32xbf16>, vector<32x16xbf16>, vector<16x16xf32> -> vector<16x16xf32>
    %37 = arith.addf %32, %36 : vector<16x16xf32>
    %38 = vector.extract_strided_slice %2 {offsets = [3, 0], sizes = [16, 32], strides = [1, 1]} : vector<20x32xbf16> to vector<16x32xbf16>
    %c3 = arith.constant 3 : index
    %c0_27 = arith.constant 0 : index
    %c0_28 = arith.constant 0 : index
    %39 = vector.load %arg3[%c3, %c0_27, %c0_28] : memref<5x32x16xbf16, #tpu.memory_space<vmem>>, vector<1x32x16xbf16>
    %40 = vector.shape_cast %39 : vector<1x32x16xbf16> to vector<32x16xbf16>
    %cst_29 = arith.constant dense<0.000000e+00> : vector<16x16xf32>
    %41 = tpu.matmul %38, %40, %cst_29 {dimension_numbers = #tpu.dot_dimension_numbers<[1], [0], [0], [1], [0, 0, 1, 1], [], []>} : vector<16x32xbf16>, vector<32x16xbf16>, vector<16x16xf32> -> vector<16x16xf32>
    %42 = arith.addf %37, %41 : vector<16x16xf32>
    %43 = vector.extract_strided_slice %2 {offsets = [4, 0], sizes = [16, 32], strides = [1, 1]} : vector<20x32xbf16> to vector<16x32xbf16>
    %c4 = arith.constant 4 : index
    %c0_30 = arith.constant 0 : index
    %c0_31 = arith.constant 0 : index
    %44 = vector.load %arg3[%c4, %c0_30, %c0_31] : memref<5x32x16xbf16, #tpu.memory_space<vmem>>, vector<1x32x16xbf16>
    %45 = vector.shape_cast %44 : vector<1x32x16xbf16> to vector<32x16xbf16>
    %cst_32 = arith.constant dense<0.000000e+00> : vector<16x16xf32>
    %46 = tpu.matmul %43, %45, %cst_32 {dimension_numbers = #tpu.dot_dimension_numbers<[1], [0], [0], [1], [0, 0, 1, 1], [], []>} : vector<16x32xbf16>, vector<32x16xbf16>, vector<16x16xf32> -> vector<16x16xf32>
    %47 = arith.addf %42, %46 : vector<16x16xf32>
    %c0_33 = arith.constant 0 : index
    %c0_34 = arith.constant 0 : index
    %48 = vector.load %arg6[%c0_33, %c0_34] : memref<1x16xf32, #tpu.memory_space<vmem>>, vector<1x16xf32>
    %49 = vector.broadcast %48 : vector<1x16xf32> to vector<16x16xf32>
    %50 = arith.addf %47, %49 : vector<16x16xf32>
    %cst_35 = arith.constant 0.000000e+00 : f32
    %51 = vector.broadcast %cst_35 : f32 to vector<16x16xf32>
    %52 = arith.maximumf %50, %51 : vector<16x16xf32>
    %cst_36 = arith.constant dense<0xFF800000> : vector<16xf32>
    %53 = vector.multi_reduction <maximumf>, %52, %cst_36 [0] : vector<16x16xf32> to vector<16xf32>
    %54 = vector.shape_cast %53 : vector<16xf32> to vector<1x16xf32>
    %55 = vector.extract_strided_slice %2 {offsets = [0, 0], sizes = [14, 32], strides = [1, 1]} : vector<20x32xbf16> to vector<14x32xbf16>
    %c0_37 = arith.constant 0 : index
    %c0_38 = arith.constant 0 : index
    %c0_39 = arith.constant 0 : index
    %56 = vector.load %arg4[%c0_37, %c0_38, %c0_39] : memref<7x32x16xbf16, #tpu.memory_space<vmem>>, vector<1x32x16xbf16>
    %57 = vector.shape_cast %56 : vector<1x32x16xbf16> to vector<32x16xbf16>
    %cst_40 = arith.constant dense<0.000000e+00> : vector<14x16xf32>
    %58 = tpu.matmul %55, %57, %cst_40 {dimension_numbers = #tpu.dot_dimension_numbers<[1], [0], [0], [1], [0, 0, 1, 1], [], []>} : vector<14x32xbf16>, vector<32x16xbf16>, vector<14x16xf32> -> vector<14x16xf32>
    %59 = vector.extract_strided_slice %2 {offsets = [1, 0], sizes = [14, 32], strides = [1, 1]} : vector<20x32xbf16> to vector<14x32xbf16>
    %c1_41 = arith.constant 1 : index
    %c0_42 = arith.constant 0 : index
    %c0_43 = arith.constant 0 : index
    %60 = vector.load %arg4[%c1_41, %c0_42, %c0_43] : memref<7x32x16xbf16, #tpu.memory_space<vmem>>, vector<1x32x16xbf16>
    %61 = vector.shape_cast %60 : vector<1x32x16xbf16> to vector<32x16xbf16>
    %cst_44 = arith.constant dense<0.000000e+00> : vector<14x16xf32>
    %62 = tpu.matmul %59, %61, %cst_44 {dimension_numbers = #tpu.dot_dimension_numbers<[1], [0], [0], [1], [0, 0, 1, 1], [], []>} : vector<14x32xbf16>, vector<32x16xbf16>, vector<14x16xf32> -> vector<14x16xf32>
    %63 = arith.addf %58, %62 : vector<14x16xf32>
    %64 = vector.extract_strided_slice %2 {offsets = [2, 0], sizes = [14, 32], strides = [1, 1]} : vector<20x32xbf16> to vector<14x32xbf16>
    %c2_45 = arith.constant 2 : index
    %c0_46 = arith.constant 0 : index
    %c0_47 = arith.constant 0 : index
    %65 = vector.load %arg4[%c2_45, %c0_46, %c0_47] : memref<7x32x16xbf16, #tpu.memory_space<vmem>>, vector<1x32x16xbf16>
    %66 = vector.shape_cast %65 : vector<1x32x16xbf16> to vector<32x16xbf16>
    %cst_48 = arith.constant dense<0.000000e+00> : vector<14x16xf32>
    %67 = tpu.matmul %64, %66, %cst_48 {dimension_numbers = #tpu.dot_dimension_numbers<[1], [0], [0], [1], [0, 0, 1, 1], [], []>} : vector<14x32xbf16>, vector<32x16xbf16>, vector<14x16xf32> -> vector<14x16xf32>
    %68 = arith.addf %63, %67 : vector<14x16xf32>
    %69 = vector.extract_strided_slice %2 {offsets = [3, 0], sizes = [14, 32], strides = [1, 1]} : vector<20x32xbf16> to vector<14x32xbf16>
    %c3_49 = arith.constant 3 : index
    %c0_50 = arith.constant 0 : index
    %c0_51 = arith.constant 0 : index
    %70 = vector.load %arg4[%c3_49, %c0_50, %c0_51] : memref<7x32x16xbf16, #tpu.memory_space<vmem>>, vector<1x32x16xbf16>
    %71 = vector.shape_cast %70 : vector<1x32x16xbf16> to vector<32x16xbf16>
    %cst_52 = arith.constant dense<0.000000e+00> : vector<14x16xf32>
    %72 = tpu.matmul %69, %71, %cst_52 {dimension_numbers = #tpu.dot_dimension_numbers<[1], [0], [0], [1], [0, 0, 1, 1], [], []>} : vector<14x32xbf16>, vector<32x16xbf16>, vector<14x16xf32> -> vector<14x16xf32>
    %73 = arith.addf %68, %72 : vector<14x16xf32>
    %74 = vector.extract_strided_slice %2 {offsets = [4, 0], sizes = [14, 32], strides = [1, 1]} : vector<20x32xbf16> to vector<14x32xbf16>
    %c4_53 = arith.constant 4 : index
    %c0_54 = arith.constant 0 : index
    %c0_55 = arith.constant 0 : index
    %75 = vector.load %arg4[%c4_53, %c0_54, %c0_55] : memref<7x32x16xbf16, #tpu.memory_space<vmem>>, vector<1x32x16xbf16>
    %76 = vector.shape_cast %75 : vector<1x32x16xbf16> to vector<32x16xbf16>
    %cst_56 = arith.constant dense<0.000000e+00> : vector<14x16xf32>
    %77 = tpu.matmul %74, %76, %cst_56 {dimension_numbers = #tpu.dot_dimension_numbers<[1], [0], [0], [1], [0, 0, 1, 1], [], []>} : vector<14x32xbf16>, vector<32x16xbf16>, vector<14x16xf32> -> vector<14x16xf32>
    %78 = arith.addf %73, %77 : vector<14x16xf32>
    %79 = vector.extract_strided_slice %2 {offsets = [5, 0], sizes = [14, 32], strides = [1, 1]} : vector<20x32xbf16> to vector<14x32xbf16>
    %c5 = arith.constant 5 : index
    %c0_57 = arith.constant 0 : index
    %c0_58 = arith.constant 0 : index
    %80 = vector.load %arg4[%c5, %c0_57, %c0_58] : memref<7x32x16xbf16, #tpu.memory_space<vmem>>, vector<1x32x16xbf16>
    %81 = vector.shape_cast %80 : vector<1x32x16xbf16> to vector<32x16xbf16>
    %cst_59 = arith.constant dense<0.000000e+00> : vector<14x16xf32>
    %82 = tpu.matmul %79, %81, %cst_59 {dimension_numbers = #tpu.dot_dimension_numbers<[1], [0], [0], [1], [0, 0, 1, 1], [], []>} : vector<14x32xbf16>, vector<32x16xbf16>, vector<14x16xf32> -> vector<14x16xf32>
    %83 = arith.addf %78, %82 : vector<14x16xf32>
    %84 = vector.extract_strided_slice %2 {offsets = [6, 0], sizes = [14, 32], strides = [1, 1]} : vector<20x32xbf16> to vector<14x32xbf16>
    %c6 = arith.constant 6 : index
    %c0_60 = arith.constant 0 : index
    %c0_61 = arith.constant 0 : index
    %85 = vector.load %arg4[%c6, %c0_60, %c0_61] : memref<7x32x16xbf16, #tpu.memory_space<vmem>>, vector<1x32x16xbf16>
    %86 = vector.shape_cast %85 : vector<1x32x16xbf16> to vector<32x16xbf16>
    %cst_62 = arith.constant dense<0.000000e+00> : vector<14x16xf32>
    %87 = tpu.matmul %84, %86, %cst_62 {dimension_numbers = #tpu.dot_dimension_numbers<[1], [0], [0], [1], [0, 0, 1, 1], [], []>} : vector<14x32xbf16>, vector<32x16xbf16>, vector<14x16xf32> -> vector<14x16xf32>
    %88 = arith.addf %83, %87 : vector<14x16xf32>
    %c0_63 = arith.constant 0 : index
    %c0_64 = arith.constant 0 : index
    %89 = vector.load %arg7[%c0_63, %c0_64] : memref<1x16xf32, #tpu.memory_space<vmem>>, vector<1x16xf32>
    %90 = vector.broadcast %89 : vector<1x16xf32> to vector<14x16xf32>
    %91 = arith.addf %88, %90 : vector<14x16xf32>
    %cst_65 = arith.constant 0.000000e+00 : f32
    %92 = vector.broadcast %cst_65 : f32 to vector<14x16xf32>
    %93 = arith.maximumf %91, %92 : vector<14x16xf32>
    %cst_66 = arith.constant dense<0xFF800000> : vector<16xf32>
    %94 = vector.multi_reduction <maximumf>, %93, %cst_66 [0] : vector<14x16xf32> to vector<16xf32>
    %95 = vector.shape_cast %94 : vector<16xf32> to vector<1x16xf32>
    %cst_67 = arith.constant 0.000000e+00 : f32
    %96 = vector.broadcast %cst_67 : f32 to vector<1x80xf32>
    %97 = tpu.concatenate %23, %54, %95, %96 in 1 : vector<1x16xf32>, vector<1x16xf32>, vector<1x16xf32>, vector<1x80xf32> -> vector<1x128xf32>
    %c0_68 = arith.constant 0 : index
    %c0_69 = arith.constant 0 : index
    %c0_70 = arith.constant 0 : index
    %98 = vector.load %arg8[%c0_68, %c0_69, %c0_70] : memref<1x1x128xf32, #tpu.memory_space<vmem>>, vector<1x1x128xf32>
    %99 = vector.shape_cast %98 : vector<1x1x128xf32> to vector<1x128xf32>
    %100 = vector.shape_cast %97 : vector<1x128xf32> to vector<1x1x128xf32>
    tpu.vector_store %arg8[%c0_68, %c0_69, %c0_70], %100 {strides = array<i32>} : memref<1x1x128xf32, #tpu.memory_space<vmem>>, vector<1x1x128xf32>,
    return
  }
  func.func @transform_0(%arg0: i32) -> (i32, i32, i32) {
    %c0_i32 = arith.constant 0 : i32
    %c0_i32_0 = arith.constant 0 : i32
    %c0_i32_1 = arith.constant 0 : i32
    return %arg0, %c0_i32, %c0_i32_0 : i32, i32, i32
  }
  func.func @transform_1(%arg0: i32) -> (i32, i32, i32) {
    %c0_i32 = arith.constant 0 : i32
    %c0_i32_0 = arith.constant 0 : i32
    %c0_i32_1 = arith.constant 0 : i32
    %c0_i32_2 = arith.constant 0 : i32
    return %c0_i32, %c0_i32_0, %c0_i32_1 : i32, i32, i32
  }
  func.func @transform_2(%arg0: i32) -> (i32, i32, i32) {
    %c0_i32 = arith.constant 0 : i32
    %c0_i32_0 = arith.constant 0 : i32
    %c0_i32_1 = arith.constant 0 : i32
    %c0_i32_2 = arith.constant 0 : i32
    return %c0_i32, %c0_i32_0, %c0_i32_1 : i32, i32, i32
  }
  func.func @transform_3(%arg0: i32) -> (i32, i32, i32) {
    %c0_i32 = arith.constant 0 : i32
    %c0_i32_0 = arith.constant 0 : i32
    %c0_i32_1 = arith.constant 0 : i32
    %c0_i32_2 = arith.constant 0 : i32
    return %c0_i32, %c0_i32_0, %c0_i32_1 : i32, i32, i32
  }
  func.func @transform_4(%arg0: i32) -> (i32, i32) {
    %c0_i32 = arith.constant 0 : i32
    %c0_i32_0 = arith.constant 0 : i32
    %c0_i32_1 = arith.constant 0 : i32
    return %c0_i32, %c0_i32_0 : i32, i32
  }
  func.func @transform_5(%arg0: i32) -> (i32, i32) {
    %c0_i32 = arith.constant 0 : i32
    %c0_i32_0 = arith.constant 0 : i32
    %c0_i32_1 = arith.constant 0 : i32
    return %c0_i32, %c0_i32_0 : i32, i32
  }
  func.func @transform_6(%arg0: i32) -> (i32, i32) {
    %c0_i32 = arith.constant 0 : i32
    %c0_i32_0 = arith.constant 0 : i32
    %c0_i32_1 = arith.constant 0 : i32
    return %c0_i32, %c0_i32_0 : i32, i32
  }
  func.func @transform_7(%arg0: i32) -> (i32, i32, i32) {
    %c0_i32 = arith.constant 0 : i32
    %c0_i32_0 = arith.constant 0 : i32
    %c0_i32_1 = arith.constant 0 : i32
    return %arg0, %c0_i32, %c0_i32_0 : i32, i32, i32
  }
}

</mosaic_0001>

<bundles_post_ra>
// kernel: _lambda_.1
= control target key start
LH: loop header
LB: loop body
LE: loop exit
PB: predicated region body
PF: predicated region fallthrough
CT: control target
= control target key end

     0   :  { %12 = vsyncpa [#allocation3], 0  ;;  %s2356_s0 = inlined_call_operand.vmem [shape: f32[2,20,32], index: 0, kind: input, shape index: {}]   ;;  %s2357_s1 = inlined_call_operand.hbm [shape: bf16[3,32,16], index: 1, kind: input, shape index: {}]   ;;  %s2358_s2 = inlined_call_operand.hbm [shape: bf16[5,32,16], index: 2, kind: input, shape index: {}]   ;;  %s2359_s3 = inlined_call_operand.vmem [shape: bf16[7,32,16], index: 3, kind: input, shape index: {}]   ;;  %s2360_s4 = inlined_call_operand.vmem [shape: f32[1,16], index: 4, kind: input, shape index: {}]   ;;  %s2361_s5 = inlined_call_operand.vmem [shape: f32[1,16], index: 5, kind: input, shape index: {}]   ;;  %s2362_s6 = inlined_call_operand.vmem [shape: f32[1,16], index: 6, kind: input, shape index: {}]   ;;  %s2363_s7 = inlined_call_operand.hbm [shape: f32[2,1,128], index: 7, kind: output, shape index: {}]  }
   0x1   :  { %13 = vsyncpa [#allocation6], 0 }
   0x2   :  { %14 = vsyncpa [#allocation4], 0 }
   0x3   :  { %16 = vsyncpa [#allocation4 + $0x1], 0  ;;  %s2003_s24 = smov 0   ;;  %s2005_s25 = smov 0  }
   0x4   :  { %s2007_s26 = smov 0   ;;  %s2009_s27 = smov 0  }
   0x5 LB: > { %s2024_s28 = sadd.s32 4294967295, %s1952_s27   ;;  %s1474_s29 = sadd.s32 4294967294, %s1952_s27   ;;  %s1952_s27 = sphi %s2009_s27, %s2383_s27   ;;  %s1948_s26 = sphi %s2007_s26, %s2382_s26   ;;  %s1944_s25 = sphi %s2005_s25, %s2381_s25   ;;  %s1940_s24 = sphi %s2003_s24, %s2380_s24  }
   0x6   : > { %s2028_s30 = sadd.s32 1, %s1952_s27   ;;  %s181_s8 = sadd.s32 1, %s1948_s26 }
   0x7   : > { %s178_s9 = ssub.s32 %s1952_s27, %s2028_s30  ;;  %p191_p0 = scmp.ne.s32.totalorder %s1948_s26, %s1944_s25 }
   0x8   : > { %p179_p1 = scmp.eq.s32.totalorder %s178_s9, 0  ;;  %p192_p2 = scmp.eq.s32.totalorder %s2024_s28, 1 }
   0x9   : > { %p197_p3 = scmp.ne.s32.totalorder %s1944_s25, %s1940_s24  ;;  %p198_p4 = scmp.eq.s32.totalorder %s1474_s29, 1 }
   0xa   : > { %s2039_s10 = scalar_select %p179_p1, %s1948_s26, %s181_s8  }
   0xb   : > { %p2041_p5 = por %p192_p2, %p191_p0  ;;  %p2045_p6 = por %p198_p4, %p197_p3 }
   0xc   : > { %2367 = sst [smem:[#allocation11_spill]] %s2039_s10  ;;  %p1475_p7 = scmp.ge.s32.totalorder %s1952_s27, 1 }
   0xd   : > { %s2368_s11 = scalar_select %p2041_p5, 1, 0 }
   0xe   : > { %s2369_s12 = scalar_select %p2045_p6, 1, 0 }
   0xf   : > { %p205_p8 = scmp.lt.s32.totalorder %s1952_s27, 3  ;;  %p2364_p9 = scmp.eq.s32.totalorder %s2024_s28, 0 }
  0x10   : > { %s1954_s14 = smov [#allocation2]   ;;  %s1955_s17 = smov [#allocation5]  }
  0x11   : > { %p2052_p10 = pnand %p1475_p7, %p205_p8  ;;  %s217_s15 = sshll.u32 %s1954_s14, 4  ;;  %s218_s15 = int_to_ptr.vmem [resolvable:$true] %s217_s15 }
  0x12   : > { %s230_s18 = sshll.u32 %s1955_s17, 4  ;;  %s1826_s21 = scalar_lea.hbm %s2357_s1, 768  ;;  %s2064_s18 = int_to_ptr.vmem [resolvable:$true] %s230_s18 }
  0x13   : > { %s2370_s13 = scalar_select %p2052_p10, 1, 0 }
  0x14   : > { %p1740_p11 = pneg %p2052_p10  ;;  %p1827_p13 = scmp.ne.s32.totalorder %s2357_s1, %s1826_s21 }
  0x15   : > { %p1833_p3 = scmp.lt.u32.totalorder %s1826_s21, %s2357_s1 }
  0x16   : > { %p2060_p12 = pnand %p2364_p9, %p1740_p11 }
  0x18   : > { %p1828_p0 = pneg %p2060_p12 }
  0x1a   : > { %p1829_p1 = pnand %p1828_p0, %p1827_p13 }
  0x1c   : > { %p1830_p2 = pneg %p1829_p1 }
  0x1e   : > { %p1835_p4 = pnand %p1833_p3, %p1830_p2 }
  0x20   : > { %1838 = shalt.err (!%p1835_p4)
}
  0x21   : > { %s1839_s9 = scalar_lea.vmem %s218_s15, 768  ;;  %p1847_p9 = scmp.lt.s32.totalorder %s218_s15, %s218_s15 }
  0x22   : > { %p1840_p7 = scmp.ne.s32.totalorder %s218_s15, %s1839_s9  ;;  %p1848_p6 = scmp.lt.s32.totalorder %s1839_s9, %s1839_s9 }
  0x24   : > { %p1842_p8 = pnand %p1840_p7, %p1828_p0  ;;  %p1849_p5 = por %p1848_p6, %p1847_p9 }
  0x26   : > { %p1843_p11 = pneg %p1842_p8 }
  0x28   : > { %p1850_p10 = pnand %p1849_p5, %p1843_p11 }
  0x2a   : > { %1853 = shalt.err (!%p1850_p10)
}
  0x2b   : > { %s1956_s14 = smov 64   ;;  %s1957_s17 = smov 4  }
  0x2c   : > { %1743 = dma.hbm_to_vmem [thread:$0]  (!%p2060_p12), %s2357_s1, 768, %s218_s15, [#allocation3], %s1956_s14, %s1956_s14, %s1957_s17  }
  0x2d   : > { %s1854_s23 = scalar_lea.hbm %s2358_s2, 1280 }
  0x2e   : > { %p1855_p13 = scmp.ne.s32.totalorder %s2358_s2, %s1854_s23  ;;  %p1861_p9 = scmp.lt.u32.totalorder %s1854_s23, %s2358_s2 }
  0x30   : > { %p1857_p5 = pnand %p1855_p13, %p1828_p0 }
  0x32   : > { %p1858_p6 = pneg %p1857_p5 }
  0x34   : > { %p1863_p10 = pnand %p1861_p9, %p1858_p6 }
  0x36   : > { %1866 = shalt.err (!%p1863_p10)
}
  0x37   : > { %s1867_s15 = scalar_lea.vmem %s2064_s18, 1280  ;;  %p1875_p4 = scmp.lt.s32.totalorder %s2064_s18, %s2064_s18 }
  0x38   : > { %p1868_p1 = scmp.ne.s32.totalorder %s2064_s18, %s1867_s15  ;;  %p1876_p7 = scmp.lt.s32.totalorder %s1867_s15, %s1867_s15 }
  0x3a   : > { %p1870_p2 = pnand %p1868_p1, %p1828_p0  ;;  %p1877_p8 = por %p1876_p7, %p1875_p4 }
  0x3c   : > { %p1871_p3 = pneg %p1870_p2 }
  0x3e   : > { %p1878_p11 = pnand %p1877_p8, %p1871_p3 }
  0x40   : > { %1881 = shalt.err (!%p1878_p11)
}
  0x41   : > { %1746 = dma.hbm_to_vmem [thread:$0]  (!%p2060_p12), %s2358_s2, 1280, %s2064_s18, [#allocation6], %s1956_s14, %s1956_s14, %s1957_s17  }
  0x42   : > { %p2372_p13 = scmp.ne.s32.totalorder %s2370_s13, 0 }
  0x43   : > { %p2373_p5 = scmp.eq.s32.totalorder (!%p2372_p13), %s2024_s28, 0 }
  0x44   : > { %266 = sbr.rel (%p2372_p13) target bundleno = 520 (0x208), region = 48 }
  0x4b   : > { %1927 = dma.done.wait (%p2373_p5), [#allocation3], 768   ;;  %p2374_p0 = pmov %p2373_p5 }
  0x4d   : > { %1929 = vsyncadd (%p2374_p0), [#allocation3], 4294966528  ;;  %p2375_p6 = pmov %p2374_p0 }
  0x4e   : > { %p2376_p9 = pmov %p2374_p0 }
  0x4f   : > { %1931 = dma.done.wait (%p2375_p6), [#allocation6], 1280  }
  0x50   : > { %1933 = vsyncadd (%p2376_p9), [#allocation6], 4294966016  ;;  %p301_p10 = scmp.lt.s32.totalorder %s2024_s28, 1  ;;  %v1796_v0 = vld [vmem:[#allocation2 + $0x10] sm:$0xff]   ;;  %v1797_v1 = vld [vmem:[#allocation2] sm:$0xff]   ;;  %vm349_vm1 = vcmask 261120  }
  0x51   : > { %1609 = vmatprep.subr.bf16.mxu0 %v1796_v0  ;;  %v1798_v2 = vld [vmem:[#allocation2 + $0x18] sm:$0xff]   ;;  %vm321_vm0 = vsmask.f32 7424  ;;  %1617 = vmatprep.subr.bf16.mxu1 %v1797_v1  ;;  %v1799_v3 = vld [vmem:[#allocation2 + $0x8] sm:$0xff]   ;;  %v1800_v9 = vld [vmem:[#allocation2 + $0x20] sm:$0xff]   ;;  %v1958_v17 = vmov 0.0  }
  0x52   : > { %s302_s16 = scalar_select %p301_p10, %s2024_s28, 1  ;;  %1610 = vmatpush3.bf16.msra.mxu0 %v1796_v0  ;;  %1618 = vmatpush3.bf16.msra.mxu1 %v1797_v1  ;;  %v1801_v14 = vld [vmem:[#allocation5 + $0x10] sm:$0xff]   ;;  %vm475_vm2 = vcmask 1046528   ;;  %v1803_v22 = vld [vmem:[#allocation5 + $0x18] sm:$0xff]   ;;  %vm1959_vm3 = vmmov 0   ;;  %v1805_v26 = vld [vmem:[#allocation5 + $0x20] sm:$0xff]  }
  0x53   : > { %1611 = vmatprep.subr.bf16.mxu0 %v1798_v2  ;;  %1619 = vmatprep.subr.bf16.mxu1 %v1799_v3  ;;  %v1802_v24 = vld [vmem:[#allocation2 + $0x28] sm:$0xff]   ;;  %v1804_v27 = vld [vmem:[#allocation5] sm:$0xff]   ;;  %v1807_v28 = vld [vmem:[#allocation5 + $0x28] sm:$0xff]   ;;  %vm825_vm4 = vcmask 1045504   ;;  %vm754_vm5 = vsmask.f32 6400 }
  0x54   : > { %s1729_s18 = smul.u32 24, %s302_s16  ;;  %v1806_v29 = vld [vmem:[#allocation5 + $0x8] sm:$0xff]   ;;  %v1809_v30 = vld [vmem:[#allocation5 + $0x40] sm:$0xff]   ;;  %v1808_v35 = vld [vmem:[#allocation5 + $0x30] sm:$0xff]   ;;  %vm1217_vm6 = vsmask.f32 5376 }
  0x55   : > { %v1811_v37 = vld [vmem:[#allocation5 + $0x48] sm:$0xff]   ;;  %v1810_v39 = vld [vmem:[#allocation5 + $0x38] sm:$0xff]   ;;  %v1813_v43 = vld [vmem:[%s2359_s3] sm:$0xff]   ;;  %vm1288_vm7 = vcmask 1044480   ;;  %vm561_vm8 = vcmask 130048   ;;  %vm564_vm9 = vcmask 123904  }
  0x56   : > { %s305_s17 = scalar_lea.vmem %s2356_s0, %s1729_s18  ;;  %1612 = vmatpush3.bf16.msra.mxu0 %v1798_v2  ;;  %1620 = vmatpush3.bf16.msra.mxu1 %v1799_v3  ;;  %v1812_v45 = vld [vmem:[%s2359_s3 + $0x10] sm:$0xff]   ;;  %v1815_v46 = vld [vmem:[%s2359_s3 + $0x8] sm:$0xff]   ;;  %v1814_v47 = vld [vmem:[%s2359_s3 + $0x18] sm:$0xff]   ;;  %s1960_s22 = smov 16   ;;  %vm1362_vm10 = vcmask 128000   ;;  %vm1381_vm11 = vcmask 392192  }
  0x57   : > { %v307_v4 = vld [vmem:[%s305_s17] sm:$0xff]  ;;  %v308_v5 = vld [vmem:[%s305_s17 + $0x8] sm:$0xff]  ;;  %v309_v6 = vld [vmem:[%s305_s17 + $0x10] sm:$0xf]  ;;  %1625 = vmatprep.subr.bf16.mxu0 %v1800_v9  ;;  %1633 = vmatprep.subr.bf16.mxu1 %v1958_v17  ;;  %s1961_s8 = smov 32   ;;  %s299_s9 = sand.u32 1, %s1944_s25  }
  0x58   : > { %v2128_v7 = vpack.c.bf16 %v308_v5, %v307_v4  ;;  %v2130_v8 = vpack.c.bf16 %v309_v6, %v309_v6  ;;  %v1817_v48 = vld [vmem:[%s2359_s3 + $0x30] sm:$0xff]   ;;  %v1816_v49 = vld [vmem:[%s2359_s3 + $0x20] sm:$0xff]   ;;  %v1819_v50 = vld [vmem:[%s2359_s3 + $0x38] sm:$0xff]   ;;  %s1558_s15 = sshll.u32 %s2024_s28, 4  ;;  %s300_s10 = scalar_lea.vmem [#allocation7], %s299_s9 }
  0x59   : > { %v1818_v51 = vld [vmem:[%s2359_s3 + $0x28] sm:$0xff]   ;;  %v1821_v53 = vld [vmem:[%s2359_s3 + $0x50] sm:$0xff]   ;;  %v1820_v58 = vld [vmem:[%s2359_s3 + $0x40] sm:$0xff]   ;;  %s1397_s19 = sshll.u32 %s300_s10, 4  ;;  %s2314_s13 = scalar_lea.hbm %s2363_s7, %s1558_s15  ;;  %s2316_s19 = int_to_ptr.vmem [resolvable:$true] %s1397_s19 }
  0x5a   : > { %v2133_v10 = vshrl.u32 %v2128_v7, 16  ;;  %v2136_v11 = vshll.u32 %v2128_v7, 16  ;;  %v2139_v12 = vshll.u32 %v2130_v8, 16  ;;  %v2142_v13 = vshrl.u32 %v2130_v8, 16  ;;  %1621 = vmatprep.mubr.msk.bf16.mxu1 %vm349_vm1, %v2128_v7  ;;  %v1823_v59 = vld [vmem:[%s2359_s3 + $0x58] sm:$0xff]   ;;  %v1822_v62 = vld [vmem:[%s2359_s3 + $0x48] sm:$0xff]  }
  0x5b   : > { %v476_v18 = vrot.slane %v2128_v7, 1  ;;  %v477_v19 = vrot.slane %v2130_v8, 1  ;;  %1622 = vmatmul.mubr.msk.bf16.vlgmr.msra.gmra.mrb[0].mxu1 %vm349_vm1, %v2130_v8  ;;  %v826_v36 = vrot.slane %v2128_v7, 2  ;;  %v827_v38 = vrot.slane %v2130_v8, 2  ;;  %v1824_v0 = vld [vmem:[%s2359_s3 + $0x60] sm:$0xff]   ;;  %v1825_v1 = vld [vmem:[%s2359_s3 + $0x68] sm:$0xff]  }
  0x5c   : > { %v327_v15 = vrot.slane %v2136_v11, 1  ;;  %v332_v16 = vrot.slane %v2139_v12, 1  ;;  %1634 = vmatpush3.bf16.msra.mxu1 %v1801_v14  ;;  %1637 = vmatprep.mubr.msk.bf16.mxu1 %vm1959_vm3, %v1958_v17  ;;  %v755_v31 = vrot.slane %v2133_v10, 1  ;;  %v756_v32 = vrot.slane %v2136_v11, 2  ;;  %s1385_s28 = scalar_lea.sflag [#allocation4], %s299_s9  ;;  %s1882_s14 = scalar_lea.vmem %s2316_s19, 16 }
  0x5d   : > { %1635 = vmatprep.subr.bf16.mxu1 %v1958_v17  ;;  %v478_v25 = vsel %vm475_vm2, %v476_v18, %v477_v19  ;;  %v758_v33 = vrot.slane %v2142_v13, 1  ;;  %v759_v34 = vrot.slane %v2139_v12, 2  ;;  %v2191_v42 = vsel %vm825_vm4, %v826_v36, %v827_v38  ;;  %p1883_p12 = scmp.ne.s32.totalorder %s2316_s19, %s1882_s14  ;;  %p2377_p1 = scmp.ne.s32.totalorder %s2368_s11, 0 }
  0x5e   : > { %v2152_v20 = vor.u32 %v327_v15, %v2133_v10  ;;  %v336_v21 = vor.u32 %v2142_v13, %v332_v16  ;;  %v757_v40 = vor.u32 %v756_v32, %v755_v31  ;;  %v1218_v54 = vrot.slane %v2133_v10, 2  ;;  %s1962_s17 = smov [#allocation7]  }
  0x5f   : > { %v760_v41 = vor.u32 %v759_v34, %v758_v33  ;;  %v1219_v55 = vrot.slane %v2136_v11, 3  ;;  %v1221_v56 = vrot.slane %v2142_v13, 2  ;;  %v1222_v57 = vrot.slane %v2139_v12, 3  ;;  %p1884_p2 = pnand %p1883_p12, %p2377_p1  ;;  %s1886_s20 = sshll.u32 %s1962_s17, 4  ;;  %s1887_s20 = int_to_ptr.vmem [resolvable:$false] %s1886_s20 }
  0x60   : > { %v333_v23 = vsel %vm321_vm0, %v2152_v20, %v332_v16  ;;  %1636 = vmatpush3.bf16.msra.mxu1 %v1803_v22  ;;  %v1093_v52 = vsel %vm754_vm5, %v757_v40, %v759_v34  ;;  %v1289_v2 = vrot.slane %v2128_v7, 3  ;;  %v1290_v3 = vrot.slane %v2130_v8, 3  ;;  %v1495_v22 = vld [vmem:[%s2360_s4] ss:$0 sm:$0xff]  ;;  %s1888_s21 = scalar_lea.vmem %s1887_s20, 32  ;;  %p1889_p4 = scmp.lt.s32.totalorder %s2316_s19, %s1887_s20 }
  0x61   : > { %1613 = vmatprep.mubr.msk.bf16.mxu0 %vm349_vm1, %v333_v23  ;;  %1649 = vmatprep.subr.bf16.mxu1 %v1958_v17  ;;  %v761_v44 = vsel %vm754_vm5, %v757_v40, %v760_v41  ;;  %v1220_v60 = vor.u32 %v1219_v55, %v1218_v54  ;;  %v1223_v61 = vor.u32 %v1222_v57, %v1221_v56  ;;  %p1885_p3 = pneg %p1884_p2  ;;  %p1890_p7 = scmp.lt.s32.totalorder %s1888_s21, %s1882_s14 }
  0x62   : > { %1614 = vmatmul.mubr.msk.bf16.vlgmr.msra.gmra.mrb[0].mxu0 %vm349_vm1, %v336_v21  ;;  %v1291_v4 = vsel %vm1288_vm7, %v1289_v2, %v1290_v3 }
  0x63   : > { %1626 = vmatpush3.bf16.msra.mxu0 %v1800_v9  ;;  %1629 = vmatprep.mubr.msk.bf16.mxu0 %vm349_vm1, %v478_v25  ;;  %v1224_v63 = vsel %vm1217_vm6, %v1220_v60, %v1223_v61  ;;  %p1891_p8 = por %p1890_p7, %p1889_p4 }
  0x64   : > { %1627 = vmatprep.subr.bf16.mxu0 %v1802_v24  ;;  %1638 = vmatmul.mubr.msk.bf16.vlgmr.msra.gmra.mrb[4].mxu1 %vm349_vm1, %v333_v23 }
  0x65   : > { %1650 = vmatpush3.bf16.msra.mxu1 %v1805_v26  ;;  %1653 = vmatprep.mubr.msk.bf16.mxu1 %vm1959_vm3, %v1958_v17  ;;  %p1892_p11 = pnand %p1891_p8, %p1885_p3 }
  0x66   : > { %1651 = vmatprep.subr.bf16.mxu1 %v1958_v17 }
  0x67   : > { %1628 = vmatpush3.bf16.msra.mxu0 %v1802_v24 }
  0x68   : > { %1641 = vmatprep.subr.bf16.mxu0 %v1958_v17 }
  0x69   : > { %1652 = vmatpush3.bf16.msra.mxu1 %v1807_v28 }
  0x6a   : > { %1630 = vmatmul.mubr.msk.bf16.vlgmr.msra.gmra.mrb[4].mxu0 %vm349_vm1, %v477_v19  ;;  %1665 = vmatprep.subr.bf16.mxu1 %v1958_v17 }
  0x6b   : > { %1642 = vmatpush3.bf16.msra.mxu0 %v1804_v27  ;;  %1645 = vmatprep.mubr.msk.bf16.mxu0 %vm1959_vm3, %v1958_v17 }
  0x6c   : > { %1643 = vmatprep.subr.bf16.mxu0 %v1958_v17  ;;  %1654 = vmatmul.mubr.msk.bf16.vlgmr.msra.gmra.mrb[8].mxu1 %vm349_vm1, %v478_v25 }
  0x6d   : > { %1666 = vmatpush3.bf16.msra.mxu1 %v1809_v30  ;;  %1669 = vmatprep.mubr.msk.bf16.mxu1 %vm1959_vm3, %v1958_v17 }
  0x6e   : > { %1667 = vmatprep.subr.bf16.mxu1 %v1958_v17 }
  0x6f   : > { %1644 = vmatpush3.bf16.msra.mxu0 %v1806_v29 }
  0x70   : > { %1657 = vmatprep.subr.bf16.mxu0 %v1958_v17 }
  0x71   : > { %1668 = vmatpush3.bf16.msra.mxu1 %v1811_v37 }
  0x72   : > { %1646 = vmatmul.mubr.msk.bf16.vlgmr.msra.gmra.mrb[8].mxu0 %vm349_vm1, %v2128_v7  ;;  %1681 = vmatprep.subr.bf16.mxu1 %v1958_v17 }
  0x73   : > { %1658 = vmatpush3.bf16.msra.mxu0 %v1808_v35  ;;  %1661 = vmatprep.mubr.msk.bf16.mxu0 %vm1959_vm3, %v1958_v17 }
  0x74   : > { %1659 = vmatprep.subr.bf16.mxu0 %v1958_v17  ;;  %1670 = vmatmul.mubr.msk.bf16.vlgmr.msra.gmra.mrb[12].mxu1 %vm349_vm1, %v2191_v42 }
  0x75   : > { %1682 = vmatpush3.bf16.msra.mxu1 %v1813_v43  ;;  %1685 = vmatprep.mubr.msk.bf16.mxu1 %vm1959_vm3, %v1958_v17 }
  0x76   : > { %1683 = vmatprep.subr.bf16.mxu1 %v1958_v17 }
  0x77   : > { %1660 = vmatpush3.bf16.msra.mxu0 %v1810_v39 }
  0x78   : > { %1673 = vmatprep.subr.bf16.mxu0 %v1958_v17 }
  0x79   : > { %1684 = vmatpush3.bf16.msra.mxu1 %v1815_v46 }
  0x7a   : > { %1662 = vmatmul.mubr.msk.bf16.vlgmr.msra.gmra.mrb[12].mxu0 %vm349_vm1, %v761_v44  ;;  %1697 = vmatprep.subr.bf16.mxu1 %v1958_v17 }
  0x7b   : > { %1674 = vmatpush3.bf16.msra.mxu0 %v1812_v45  ;;  %1677 = vmatprep.mubr.msk.bf16.mxu0 %vm1959_vm3, %v1958_v17 }
  0x7c   : > { %1675 = vmatprep.subr.bf16.mxu0 %v1958_v17  ;;  %1686 = vmatmul.mubr.msk.bf16.vlgmr.msra.gmra.mrb[16].mxu1 %vm349_vm1, %v2128_v7 }
  0x7d   : > { %1698 = vmatpush3.bf16.msra.mxu1 %v1817_v48  ;;  %1701 = vmatprep.mubr.msk.bf16.mxu1 %vm1959_vm3, %v1958_v17 }
  0x7e   : > { %1699 = vmatprep.subr.bf16.mxu1 %v1958_v17 }
  0x7f   : > { %1676 = vmatpush3.bf16.msra.mxu0 %v1814_v47 }
  0x80   : > { %1689 = vmatprep.subr.bf16.mxu0 %v1958_v17 }
  0x81   : > { %1700 = vmatpush3.bf16.msra.mxu1 %v1819_v50 }
  0x82   : > { %1678 = vmatmul.mubr.msk.bf16.vlgmr.msra.gmra.mrb[16].mxu0 %vm349_vm1, %v2152_v20  ;;  %1713 = vmatprep.subr.bf16.mxu1 %v1958_v17 }
  0x83   : > { %1690 = vmatpush3.bf16.msra.mxu0 %v1816_v49  ;;  %1693 = vmatprep.mubr.msk.bf16.mxu0 %vm1959_vm3, %v1958_v17 }
  0x84   : > { %1691 = vmatprep.subr.bf16.mxu0 %v1958_v17  ;;  %1702 = vmatmul.mubr.msk.bf16.vlgmr.msra.gmra.mrb[20].mxu1 %vm349_vm1, %v1093_v52 }
  0x85   : > { %1714 = vmatpush3.bf16.msra.mxu1 %v1821_v53  ;;  %1717 = vmatprep.mubr.msk.bf16.mxu1 %vm1959_vm3, %v1958_v17 }
  0x86   : > { %1715 = vmatprep.subr.bf16.mxu1 %v1958_v17 }
  0x87   : > { %1692 = vmatpush3.bf16.msra.mxu0 %v1818_v51 }
  0x88   : > { %1705 = vmatprep.subr.bf16.mxu0 %v1958_v17 }
  0x89   : > { %1716 = vmatpush3.bf16.msra.mxu1 %v1823_v59  ;;  %v1511_v59 = vld [vmem:[%s2361_s5] ss:$0 sm:$0xff] }
  0x8a   : > { %1694 = vmatmul.mubr.msk.bf16.vlgmr.msra.gmra.mrb[20].mxu0 %vm349_vm1, %v476_v18 }
  0x8b   : > { %1706 = vmatpush3.bf16.msra.mxu0 %v1820_v58  ;;  %1709 = vmatprep.mubr.msk.bf16.mxu0 %vm1959_vm3, %v1958_v17 }
  0x8c   : > { %1707 = vmatprep.subr.bf16.mxu0 %v1958_v17  ;;  %1718 = vmatmul.mubr.msk.bf16.vlgmr.msra.gmra.mrb[24].mxu1 %vm349_vm1, %v1224_v63 }
  0x8f   : > { %1708 = vmatpush3.bf16.msra.mxu0 %v1822_v62 }
  0x90   : > { %1721 = vmatprep.subr.bf16.mxu0 %v1958_v17 }
  0x92   : > { %1710 = vmatmul.mubr.msk.bf16.vlgmr.msra.gmra.mrb[24].mxu0 %vm349_vm1, %v2191_v42 }
  0x93   : > { %1722 = vmatpush3.bf16.msra.mxu0 %v1824_v0  ;;  %1725 = vmatprep.mubr.msk.bf16.mxu0 %vm1959_vm3, %v1958_v17 }
  0x94   : > { %1723 = vmatprep.subr.bf16.mxu0 %v1958_v17 }
  0x97   : > { %1724 = vmatpush3.bf16.msra.mxu0 %v1825_v1 }
  0x9a   : > { %1726 = vmatmul.mubr.msk.bf16.vlgmr.msra.gmra.mrb[28].mxu0 %vm349_vm1, %v1291_v4 }
 0x12e   : > { %v1623_v5 = vpop.f32.mrb[0].mxu1 }
 0x12f   : > { %v454_v6 = vpop.f32.mrb[1].mxu1 }
 0x130   : > { %v1624_v9 = vpop.f32.mrb[2].mxu1 }
 0x131   : > { %v457_v10 = vpop.f32.mrb[3].mxu1 }
 0x135   : > { %v1615_v11 = vpop.f32.mrb[0].mxu0 }
 0x136   : > { %v463_v12 = vadd.f32 %v1623_v5, %v1615_v11  ;;  %v390_v13 = vpop.f32.mrb[1].mxu0 }
 0x137   : > { %v455_v14 = vadd.f32 %v454_v6, %v390_v13  ;;  %v1616_v15 = vpop.f32.mrb[2].mxu0  ;;  %v629_v18 = vpop.f32.mrb[4].mxu1 }
 0x138   : > { %v393_v16 = vpop.f32.mrb[3].mxu0  ;;  %v1639_v8 = vpop.f32.mrb[5].mxu1 }
 0x139   : > { %v458_v7 = vadd.f32 %v457_v10, %v393_v16  ;;  %v632_v19 = vpop.f32.mrb[6].mxu1 }
 0x13a   : > { %v1640_v17 = vpop.f32.mrb[7].mxu1 }
 0x13d   : > { %v1631_v20 = vpop.f32.mrb[4].mxu0 }
 0x13e   : > { %v547_v21 = vadd.f32 %v1631_v20, %v463_v12  ;;  %v531_v23 = vpop.f32.mrb[5].mxu0 }
 0x13f   : > { %v545_v24 = vadd.f32 %v531_v23, %v455_v14  ;;  %v1632_v25 = vpop.f32.mrb[6].mxu0  ;;  %v740_v30 = vpop.f32.mrb[8].mxu1 }
 0x140   : > { %v534_v26 = vpop.f32.mrb[7].mxu0  ;;  %v557_v27 = vadd.f32 %v1495_v22, %v547_v21  ;;  %v1655_v31 = vpop.f32.mrb[9].mxu1 }
 0x141   : > { %v555_v28 = vadd.f32 %v1495_v22, %v545_v24  ;;  %v546_v29 = vadd.f32 %v534_v26, %v458_v7  ;;  %v743_v34 = vpop.f32.mrb[10].mxu1 }
 0x142   : > { %v1656_v35 = vpop.f32.mrb[11].mxu1  ;;  %v560_v36 = vmax.f32 %v557_v27, 0.0 }
 0x143   : > { %v558_v32 = vmax.f32 %v555_v28, 0.0  ;;  %v556_v33 = vadd.f32 %v1495_v22, %v546_v29 }
 0x144   : > { %v565_v48 = vsel %vm564_vm9, %v560_v36, -inf }
 0x145   : > { %v559_v37 = vmax.f32 %v556_v33, 0.0  ;;  %v682_v38 = vpop.f32.mrb[8].mxu0  ;;  %v562_v41 = vsel %vm561_vm8, %v558_v32, -inf }
 0x146   : > { %v683_v39 = vadd.f32 %v682_v38, %v629_v18  ;;  %v1647_v40 = vpop.f32.mrb[9].mxu0 }
 0x147   : > { %v563_v42 = vsel %vm561_vm8, %v559_v37, -inf  ;;  %v685_v43 = vpop.f32.mrb[10].mxu0  ;;  %v878_v49 = vpop.f32.mrb[12].mxu1 }
 0x148   : > { %v566_v44 = vmax.f32 %v562_v41, %v563_v42  ;;  %v686_v45 = vadd.f32 %v685_v43, %v632_v19  ;;  %v747_v46 = vadd.f32 %v740_v30, %v683_v39  ;;  %v1648_v47 = vpop.f32.mrb[11].mxu0  ;;  %v1671_v52 = vpop.f32.mrb[13].mxu1 }
 0x149   : > { %v881_v53 = vpop.f32.mrb[14].mxu1 }
 0x14a   : > { %v2294_v50 = vmax.f32 %v566_v44, %v565_v48  ;;  %v748_v51 = vadd.f32 %v743_v34, %v686_v45  ;;  %v1672_v54 = vpop.f32.mrb[15].mxu1  ;;  %v1557_v48 = vld [vmem:[%s2362_s6] ss:$0 sm:$0xff] }
 0x14d   : > { %v811_v55 = vpop.f32.mrb[12].mxu0 }
 0x14e   : > { %v818_v56 = vadd.f32 %v811_v55, %v747_v46  ;;  %v1663_v57 = vpop.f32.mrb[13].mxu0 }
 0x14f   : > { %v814_v58 = vpop.f32.mrb[14].mxu0  ;;  %v1018_v63 = vpop.f32.mrb[16].mxu1 }
 0x150   : > { %v819_v60 = vadd.f32 %v814_v58, %v748_v51  ;;  %v885_v61 = vadd.f32 %v878_v49, %v818_v56  ;;  %v1664_v62 = vpop.f32.mrb[15].mxu0  ;;  %v1687_v2 = vpop.f32.mrb[17].mxu1 }
 0x151   : > { %v1021_v3 = vpop.f32.mrb[18].mxu1 }
 0x152   : > { %v894_v0 = vadd.f32 %v1511_v59, %v885_v61  ;;  %v886_v1 = vadd.f32 %v881_v53, %v819_v60  ;;  %v1688_v6 = vpop.f32.mrb[19].mxu1 }
 0x154   : > { %v896_v4 = vmax.f32 %v894_v0, 0.0  ;;  %v895_v5 = vadd.f32 %v1511_v59, %v886_v1 }
 0x155   : > { %v965_v9 = vpop.f32.mrb[16].mxu0 }
 0x156   : > { %v897_v10 = vmax.f32 %v895_v5, 0.0  ;;  %v1019_v11 = vadd.f32 %v1018_v63, %v965_v9  ;;  %v1679_v12 = vpop.f32.mrb[17].mxu0  ;;  %v898_v14 = vsel %vm561_vm8, %v896_v4, -inf  ;;  %v568_v4 = vrot.slane %v2294_v50, 4 }
 0x157   : > { %v968_v13 = vpop.f32.mrb[18].mxu0  ;;  %v1143_v8 = vpop.f32.mrb[20].mxu1 }
 0x158   : > { %v899_v15 = vsel %vm561_vm8, %v897_v10, -inf  ;;  %v1022_v16 = vadd.f32 %v1021_v3, %v968_v13  ;;  %v1680_v7 = vpop.f32.mrb[19].mxu0  ;;  %v1703_v19 = vpop.f32.mrb[21].mxu1  ;;  %v569_v5 = vmax.f32 %v2294_v50, %v568_v4 }
 0x159   : > { %v900_v18 = vmax.f32 %v898_v14, %v899_v15  ;;  %v1146_v20 = vpop.f32.mrb[22].mxu1 }
 0x15a   : > { %v1704_v22 = vpop.f32.mrb[23].mxu1  ;;  %v570_v6 = vrot.slane %v569_v5, 2 }
 0x15b   : > { %v901_v17 = vrot.slane %v900_v18, 4 }
 0x15c   : > { %v571_v9 = vmax.f32 %v569_v5, %v570_v6 }
 0x15d   : > { %v1079_v21 = vpop.f32.mrb[20].mxu0  ;;  %v902_v23 = vmax.f32 %v900_v18, %v901_v17 }
 0x15e   : > { %v1086_v24 = vadd.f32 %v1079_v21, %v1019_v11  ;;  %v1695_v25 = vpop.f32.mrb[21].mxu0  ;;  %v572_v10 = vrot.slane %v571_v9, 1 }
 0x15f   : > { %v1082_v26 = vpop.f32.mrb[22].mxu0  ;;  %v903_v27 = vrot.slane %v902_v23, 2  ;;  %v1274_v33 = vpop.f32.mrb[24].mxu1 }
 0x160   : > { %v1087_v28 = vadd.f32 %v1082_v26, %v1022_v16  ;;  %v1150_v29 = vadd.f32 %v1143_v8, %v1086_v24  ;;  %v1696_v30 = vpop.f32.mrb[23].mxu0  ;;  %v1719_v35 = vpop.f32.mrb[25].mxu1  ;;  %v573_v12 = vmax.f32 %v571_v9, %v572_v10 }
 0x161   : > { %v904_v31 = vmax.f32 %v902_v23, %v903_v27  ;;  %v1277_v36 = vpop.f32.mrb[26].mxu1 }
 0x162   : > { %v1151_v32 = vadd.f32 %v1146_v20, %v1087_v28  ;;  %v1720_v39 = vpop.f32.mrb[27].mxu1 }
 0x163   : > { %v905_v34 = vrot.slane %v904_v31, 1 }
 0x165   : > { %v1203_v37 = vpop.f32.mrb[24].mxu0  ;;  %v906_v38 = vmax.f32 %v904_v31, %v905_v34 }
 0x166   : > { %v1210_v40 = vadd.f32 %v1203_v37, %v1150_v29  ;;  %v1711_v41 = vpop.f32.mrb[25].mxu0 }
 0x167   : > { %1372 = vrot.lane.b32.xlu0 %v906_v38, %s1960_s22  ;;  %v1206_v42 = vpop.f32.mrb[26].mxu0 }
 0x168   : > { %v1281_v43 = vadd.f32 %v1274_v33, %v1210_v40  ;;  %v1211_v44 = vadd.f32 %v1206_v42, %v1151_v32  ;;  %v1712_v45 = vpop.f32.mrb[27].mxu0 }
 0x16a   : > { %v1282_v46 = vadd.f32 %v1277_v36, %v1211_v44 }
 0x16d   : > { %v1341_v47 = vpop.f32.mrb[28].mxu0 }
 0x16e   : > { %v1348_v49 = vadd.f32 %v1341_v47, %v1281_v43  ;;  %v1727_v51 = vpop.f32.mrb[29].mxu0 }
 0x16f   : > { %v1344_v52 = vpop.f32.mrb[30].mxu0 }
 0x170   : > { %v1357_v53 = vadd.f32 %v1557_v48, %v1348_v49  ;;  %v1349_v54 = vadd.f32 %v1344_v52, %v1282_v46  ;;  %v1728_v55 = vpop.f32.mrb[31].mxu0 }
 0x172   : > { %v1359_v56 = vmax.f32 %v1357_v53, 0.0  ;;  %v1358_v57 = vadd.f32 %v1557_v48, %v1349_v54 }
 0x174   : > { %v1360_v58 = vmax.f32 %v1358_v57, 0.0  ;;  %v1361_v59 = vsel %vm561_vm8, %v1359_v56, -inf }
 0x176   : > { %v1363_v60 = vsel %vm1362_vm10, %v1360_v58, -inf }
 0x177   : > { %v1364_v61 = vmax.f32 %v1361_v59, %v1363_v60 }
 0x179   : > { %v1365_v62 = vrot.slane %v1364_v61, 4 }
 0x17b   : > { %v1366_v63 = vmax.f32 %v1364_v61, %v1365_v62 }
 0x17d   : > { %v1367_v0 = vrot.slane %v1366_v63, 2 }
 0x17f   : > { %v1368_v1 = vmax.f32 %v1366_v63, %v1367_v0 }
 0x181   : > { %v1369_v2 = vrot.slane %v1368_v1, 1 }
 0x183   : > { %v1370_v3 = vmax.f32 %v1368_v1, %v1369_v2 }
 0x185   : > { %1376 = vrot.lane.b32.xlu0 %v1370_v3, %s1961_s8 }
 0x1d9   : > { %v1373_v11 = vpop.permute.xlu0 %1372 }
 0x1da   : > { %v1379_v13 = vsel %vm561_vm8, %v573_v12, %v1373_v11 }
 0x1f7   : > { %v1377_v14 = vpop.permute.xlu0 %1376 }
 0x1f8   : > { %v1380_v15 = vsel %vm349_vm1, %v1379_v13, %v1377_v14 }
 0x1f9   : > { %v1382_v50 = vsel %vm1381_vm11, %v1380_v15, 0.0 }
 0x1fa   : > { %1383 = vst [vmem:[%s300_s10] sm:$0x1] %v1382_v50 }
 0x1fb   : > { %1895 = shalt.err (!%p1892_p11)
}
 0x1fc   : > { %s1896_s22 = scalar_lea.hbm %s2314_s13, 16  ;;  %s1900_s8 = scalar_lea.hbm %s2363_s7, 32 }
 0x1fd   : > { %p1897_p13 = scmp.ne.s32.totalorder %s2314_s13, %s1896_s22  ;;  %p1901_p6 = scmp.lt.u32.totalorder %s2314_s13, %s2363_s7 }
 0x1fe   : > { %p1902_p9 = scmp.lt.u32.totalorder %s1900_s8, %s1896_s22  ;;  %p1904_p12 = scmp.lt.u32.totalorder %s1896_s22, %s2314_s13 }
 0x1ff   : > { %p1898_p5 = pnand %p1897_p13, %p2377_p1 }
 0x200   : > { %p1903_p10 = por %p1902_p9, %p1901_p6 }
 0x201   : > { %p1899_p0 = pneg %p1898_p5 }
 0x202   : > { %p1905_p2 = por %p1904_p12, %p1903_p10 }
 0x204   : > { %p1906_p3 = pnand %p1905_p2, %p1899_p0 }
 0x206   : > { %1909 = shalt.err (!%p1906_p3)
}
 0x207   : > { %1738 = dma.vmem_to_hbm [thread:$0]  (%p2377_p1), %s2316_s19, 16, %s2314_s13, %s1385_s28  }
 0x208 PF: > { %p1755_p4 = scmp.ge.s32.totalorder %s1952_s27, 2  ;;  %s1409_s10 = sand.u32 1, %s1940_s24  }
 0x209   : > { %p2378_p7 = scmp.ne.s32.totalorder %s2369_s12, 0  ;;  %s1410_s16 = scalar_lea.sflag [#allocation4], %s1409_s10 }
 0x20b   : > { %p1748_p8 = pnand %p1755_p4, %p2378_p7 }
 0x20d   : > { %1935 = dma.done.wait (!%p1748_p8), %s1410_s16, 16  }
 0x20e   : > { %1937 = vsyncadd (!%p1748_p8), %s1410_s16, 4294967280  ;;  %s2379_s18 = sld [smem:[#allocation11_spill]]  ;;  %p19_p11 = scmp.ge.s32.totalorder %s2028_s30, 4  }
 0x20f   : > { %s2380_s24 = smov %s1944_s25  ;;  %s2381_s25 = smov %s1948_s26 }
 0x210   : > { %s2383_s27 = smov %s2028_s30  ;;  %21 = sbr.rel (!%p19_p11) target bundleno = 5 (0x5), region = 104 }
 0x214   : > { %s2382_s26 = smov %s2379_s18 }
 0x217   :  { %1414 = vsyncpa [#allocation3], 1 }
 0x218   :  { %1416 = vsyncpa [#allocation3 + $0x1], 1 }
 0x219   :  { %1417 = vsyncpa [#allocation6], 1 }
 0x21a   :  { %1418 = vsyncpa [#allocation4], 1 }
 0x21b   :  { %1420 = vsyncpa [#allocation4 + $0x1], 1 }

</bundles_post_ra>
